<compile_context>
chip_gen: v7x
topology: tpu7x:2x2x1
jax: 0.10.0
libtpu: 0.0.40
codegen_flags: <defaults>
</compile_context>

<pallas_src>
import math
from functools import partial

import jax
import jax.numpy as jnp
from jax import lax
from jax.experimental import pallas as pl
from jax.experimental.pallas import tpu as pltpu

_LANE = 128  # lane tiling (last dim)


def _round_up(x, m):
    return (x + m - 1) // m * m


def _min_sublane(dtype):
    # rows packed per vreg sublane group: f32 -> 8, bf16 -> 16, int8/fp8 -> 32
    return {4: 8, 2: 16, 1: 32}[jnp.dtype(dtype).itemsize]


def _nonlin(a, non_linearity):
    if non_linearity == "tanh":
        return jnp.tanh(a)          # EUP
    return jnp.maximum(a, 0.0)      # VPU


# --------------------------------------------------------------------------
# Plain projection kernel:  o = [nonlin](x @ Wt).  Used for the hoisted
# Z = xs @ W.T pre-compute and for the b_prev=None single-step fast path.
# --------------------------------------------------------------------------
def _proj_kernel(x_ref, wt_ref, o_ref, *, non_linearity=None):
    a = jnp.dot(x_ref[...], wt_ref[...], preferred_element_type=jnp.float32)
    if non_linearity is not None:
        a = _nonlin(a, non_linearity)
    o_ref[...] = a.astype(o_ref.dtype)


# --------------------------------------------------------------------------
# Single-step kernel (matches RNN.forward exactly): two MXU dots, no
# HBM-side concatenation of activations or weights.
# --------------------------------------------------------------------------
def _cell_kernel(x_ref, wt_ref, b_ref, ut_ref, o_ref, *, non_linearity):
    a = jnp.dot(x_ref[...], wt_ref[...], preferred_element_type=jnp.float32)
    a = a + jnp.dot(b_ref[...], ut_ref[...], preferred_element_type=jnp.float32)
    o_ref[...] = _nonlin(a, non_linearity).astype(o_ref.dtype)


def rnn_cell(x, W, U, b_prev=None, non_linearity="tanh"):
    """tanh/relu(x @ W.T + b_prev @ U.T) — single timestep.

    NOTE: for a whole sequence use rnn_forward(); it keeps U.T resident in
    VMEM and does not re-pad / re-upload weights every step.
    """
    B, in_f = x.shape
    out_f, w_in = W.shape
    assert w_in == in_f, f"Wrong x size: {x.shape}"
    if b_prev is not None:
        assert b_prev.shape == (B, out_f), f"Wrong b size: {b_prev.shape}"

    B_p = _round_up(B, _min_sublane(x.dtype))
    in_p = _round_up(in_f, _LANE)
    out_p = _round_up(out_f, _LANE)

    x_p = jnp.pad(x, ((0, B_p - B), (0, in_p - in_f)))
    Wt = jnp.pad(W.T, ((0, in_p - in_f), (0, out_p - out_f))).astype(x.dtype)

    if b_prev is None:
        # Fast path: b_prev == 0 -> skip the U matmul and its weight DMA.
        cost = pl.CostEstimate(
            flops=2 * B_p * in_p * out_p,
            transcendentals=B_p * out_p if non_linearity == "tanh" else 0,
            bytes_accessed=4 * (B_p * in_p + in_p * out_p + B_p * out_p))
        out = pl.pallas_call(
            partial(_proj_kernel, non_linearity=non_linearity),
            out_shape=jax.ShapeDtypeStruct((B_p, out_p), x.dtype),
            cost_estimate=cost,
        )(x_p, Wt)
    else:
        b_p = jnp.pad(b_prev, ((0, B_p - B), (0, out_p - out_f))).astype(x.dtype)
        Ut = jnp.pad(U.T, ((0, out_p - out_f), (0, out_p - out_f))).astype(x.dtype)
        cost = pl.CostEstimate(
            flops=2 * B_p * (in_p + out_p) * out_p,
            transcendentals=B_p * out_p if non_linearity == "tanh" else 0,
            bytes_accessed=4 * (B_p * (in_p + out_p)
                                + (in_p + out_p) * out_p + B_p * out_p))
        # TODO(synk): for very large B/out_f add BlockSpec tiling here; the
        # single-step path assumes whole operands fit scoped VMEM.
        out = pl.pallas_call(
            partial(_cell_kernel, non_linearity=non_linearity),
            out_shape=jax.ShapeDtypeStruct((B_p, out_p), x.dtype),
            cost_estimate=cost,
        )(x_p, Wt, b_p, Ut)
    return out[:B, :out_f]


# --------------------------------------------------------------------------
# Recurrence kernel: h_t = nonlin(Z_t + h_{t-1} @ U.T), TT timesteps per
# grid step, hidden state carried in a VMEM scratch, U.T VMEM-resident.
# --------------------------------------------------------------------------
def _recur_kernel(z_ref, ut_ref, b0_ref, o_ref, h_ref, *, non_linearity, tt):
    # INVARIANT: the h_ref carry relies on the time axis being the LAST,
    # 'arbitrary', sequentially-iterated grid axis (innermost per batch tile).
    # Do not reorder grid axes or mark time as 'parallel'.
    t_blk = pl.program_id(1)

    @pl.when(t_blk == 0)
    def _():
        h_ref[...] = b0_ref[...]          # h_{-1} for this batch tile

    def step(i, carry):
        # One MXU push per step: K = out_p only (x @ W.T was hoisted into Z).
        a = z_ref[i].astype(jnp.float32) + jnp.dot(
            h_ref[...], ut_ref[...], preferred_element_type=jnp.float32)
        h = _nonlin(a, non_linearity)      # f32 epilogue (v5e-friendly)
        h_ref[...] = h.astype(h_ref.dtype)  # carry h_t
        o_ref[i] = h.astype(o_ref.dtype)    # store into the (TT, tb, out_p) block
        return carry

    lax.fori_loop(0, tt, step, 0, unroll=True)


def rnn_forward(xs, W, U, b0=None, non_linearity="tanh",
                compute_dtype=None, batch_tile=None, time_block=None):
    """Full RNN recurrence: xs [T, B, in_features] -> [T, B, out_features].

    compute_dtype=jnp.bfloat16 halves weight/activation VMEM + HBM traffic and
    runs the MXU at native bf16 rate (accumulation + tanh stay f32); the
    carried hidden state is then rounded to bf16 each step, so use looser
    tolerances for long sequences.  Default keeps the input dtype (exact).
    """
    T, B, in_f = xs.shape
    out_f, w_in = W.shape
    assert w_in == in_f, f"Wrong x size: {xs.shape}"
    if b0 is not None:
        assert b0.shape == (B, out_f), f"Wrong b size: {b0.shape}"

    out_dtype = xs.dtype
    cdt = out_dtype if compute_dtype is None else compute_dtype
    itemsize = jnp.dtype(cdt).itemsize
    out_itemsize = jnp.dtype(out_dtype).itemsize
    min_tb = _min_sublane(cdt)

    in_p = _round_up(in_f, _LANE)
    out_p = _round_up(out_f, _LANE)
    B_p = _round_up(B, min_tb)

    # Batch tile: >=2 tiles when possible so the 'parallel' batch axis can be
    # sharded across v7x's two TensorCores; capped so the f32 epilogue working
    # set stays in vregs; never below the dtype's sublane packing.
    if batch_tile is None:
        tb = B_p
        if B_p >= 2 * min_tb and B_p % (2 * min_tb) == 0:
            tb = B_p // 2
        while tb > 256 and tb % (2 * min_tb) == 0:
            tb //= 2
    else:
        tb = batch_tile
    assert B_p % tb == 0 and tb % min_tb == 0, (B_p, tb, min_tb)

    # Time block: amortise per-grid-step overhead; one big lane-dense output
    # DMA per TT steps.
    TT = (T if T <= 32 else 16) if time_block is None else time_block
    T_p = _round_up(T, TT)

    # ---- Stage 1: hoist the input projection off the serial critical path:
    #      Z = xs @ W.T for ALL timesteps as one big matmul. ------------------
    xs_p = jnp.pad(
        xs, ((0, T_p - T), (0, B_p - B), (0, in_p - in_f))).astype(cdt)
    Wt = jnp.pad(W.T, ((0, in_p - in_f), (0, out_p - out_f))).astype(cdt)
    xs_flat = xs_p.reshape(T_p * B_p, in_p)          # free (row-major)

    M = T_p * B_p
    tm = B_p * TT                                    # divides M (T_p % TT == 0)
    if 2 * tm * (in_p + out_p) * itemsize > 8 * 1024 * 1024:
        tm = B_p                                     # also divides M
    proj_cost = pl.CostEstimate(
        flops=2 * M * in_p * out_p, transcendentals=0,
        bytes_accessed=itemsize * (M * in_p + in_p * out_p + M * out_p))
    # TODO(synk): tile in_p (K) / out_p (N) here too if W alone overflows VMEM.
    z_flat = pl.pallas_call(
        _proj_kernel,
        out_shape=jax.ShapeDtypeStruct((M, out_p), cdt),
        grid=(M // tm,),
        in_specs=[pl.BlockSpec((tm, in_p), lambda i: (i, 0)),
                  pl.BlockSpec((in_p, out_p), lambda i: (0, 0))],
        out_specs=pl.BlockSpec((tm, out_p), lambda i: (i, 0)),
        compiler_params=pltpu.CompilerParams(
            dimension_semantics=("parallel",)),
        cost_estimate=proj_cost,
    )(xs_flat, Wt)
    z = z_flat.reshape(T_p, B_p, out_p)

    # ---- Stage 2: the recurrence h_t = nonlin(Z_t + h_{t-1} @ U.T). ---------
    Ut = jnp.pad(U.T, ((0, out_p - out_f), (0, out_p - out_f))).astype(cdt)
    if b0 is None:
        b0_p = jnp.zeros((B_p, out_p), cdt)
    else:
        b0_p = jnp.pad(b0, ((0, B_p - B), (0, out_p - out_f))).astype(cdt)

    vmem_need = (
        2 * out_p * out_p * itemsize            # Ut (default double-buffered)
        + 2 * TT * tb * out_p * itemsize        # Z blocks
        + 2 * tb * out_p * itemsize             # b0
        + 2 * TT * tb * out_p * out_itemsize    # output blocks
        + tb * out_p * itemsize                 # h scratch
        + 2 * tb * out_p * 4)                   # f32 epilogue headroom
    vmem_limit = int(min(max(2 * vmem_need, 32 * 1024 * 1024),
                         64 * 1024 * 1024))     # stay under v7x physical cap

    rec_cost = pl.CostEstimate(
        flops=2 * T_p * B_p * out_p * out_p + T_p * B_p * out_p,
        transcendentals=T_p * B_p * out_p if non_linearity == "tanh" else 0,
        bytes_accessed=itemsize * (T_p * B_p * out_p + out_p * out_p
                                   + B_p * out_p)
        + out_itemsize * T_p * B_p * out_p)

    # TODO(synk): if out_p*out_p alone overflows VMEM, tile U.T along the
    # output (N) dimension (h kept full-width in scratch) rather than K-tiling.
    # TODO(synk): pipeline_mode=pl.Buffered(1) on the Ut/b0 specs would drop
    # their second VMEM buffer (useful on v7x's 64 MiB).
    out = pl.pallas_call(
        partial(_recur_kernel, non_linearity=non_linearity, tt=TT),
        out_shape=jax.ShapeDtypeStruct((T_p, B_p, out_p), out_dtype),
        grid=(B_p // tb, T_p // TT),
        in_specs=[
            # Z block: changes every grid step.
            pl.BlockSpec((TT, tb, out_p), lambda b, t: (t, b, 0)),
            # U.T: constant block index -> DMA'd once, stays VMEM resident.
            pl.BlockSpec((out_p, out_p), lambda b, t: (0, 0)),
            # Initial hidden state: one block per batch tile.
            pl.BlockSpec((tb, out_p), lambda b, t: (b, 0)),
        ],
        out_specs=pl.BlockSpec((TT, tb, out_p), lambda b, t: (t, b, 0)),
        scratch_shapes=[pltpu.VMEM((tb, out_p), cdt)],   # hidden-state carry
        compiler_params=pltpu.CompilerParams(
            # Batch 'parallel' (megacore-shardable); time MUST stay innermost
            # 'arbitrary' for the hidden-state carry to be valid.
            dimension_semantics=("parallel", "arbitrary"),
            vmem_limit_bytes=vmem_limit,
        ),
        cost_estimate=rec_cost,
    )(z, Ut, b0_p)
    return out[:T, :B, :out_f]


def init_rnn_params(key, in_features, out_features):
    """PyTorch-style init: uniform(-sqrt(1/out), sqrt(1/out))."""
    bound = math.sqrt(1.0 / out_features)
    kw, ku = jax.random.split(key)
    W = jax.random.uniform(
        kw, (out_features, in_features), jnp.float32, minval=-bound, maxval=bound)
    U = jax.random.uniform(
        ku, (out_features, out_features), jnp.float32, minval=-bound, maxval=bound)
    return W, U


if __name__ == "__main__":
    key = jax.random.PRNGKey(0)
    k_params, k_x, k_b, k_seq, k_seq2 = jax.random.split(key, 5)

    B, in_f, out_f, T = 2, 16, 32, 8
    W, U = init_rnn_params(k_params, in_f, out_f)
    x = jax.random.normal(k_x, (B, in_f), jnp.float32)
    b_prev = jax.random.normal(k_b, (B, out_f), jnp.float32)
    xs = jax.random.normal(k_seq, (T, B, in_f), jnp.float32)

    # --- single step, matches PyTorch RNN.forward exactly ---
    out = jax.block_until_ready(rnn_cell(x, W, U, b_prev, non_linearity="tanh"))
    ref = jnp.tanh(x @ W.T + b_prev @ U.T)
    assert out.shape == (B, out_f)
    assert jnp.allclose(out, ref, atol=1e-5, rtol=1e-5)

    # --- single step, b_prev=None fast path (skips the U matmul) ---
    out2 = jax.block_until_ready(rnn_cell(x, W, U, None, non_linearity="tanh"))
    assert jnp.allclose(out2, jnp.tanh(x @ W.T), atol=1e-5, rtol=1e-5)

    # --- full recurrence, f32 (exact path) ---
    def ref_seq(xs_, W_, U_, h0, relu=False):
        h = h0
        hs = []
        for t in range(xs_.shape[0]):
            a = xs_[t] @ W_.T + h @ U_.T
            h = jnp.maximum(a, 0.0) if relu else jnp.tanh(a)
            hs.append(h)
        return jnp.stack(hs)

    outs = jax.block_until_ready(rnn_forward(xs, W, U, b0=None))
    refs = ref_seq(xs, W, U, jnp.zeros((B, out_f), jnp.float32))
    assert outs.shape == (T, B, out_f)
    assert jnp.allclose(outs, refs, atol=1e-4, rtol=1e-4)

    # --- full recurrence with a provided initial hidden state ---
    outs_b0 = jax.block_until_ready(rnn_forward(xs, W, U, b0=b_prev))
    refs_b0 = ref_seq(xs, W, U, b_prev)
    assert jnp.allclose(outs_b0, refs_b0, atol=1e-4, rtol=1e-4)

    # --- relu variant ---
    outs_relu = jax.block_until_ready(rnn_forward(xs, W, U, non_linearity="relu"))
    refs_relu = ref_seq(xs, W, U, jnp.zeros((B, out_f), jnp.float32), relu=True)
    assert jnp.allclose(outs_relu, refs_relu, atol=1e-4, rtol=1e-4)

    # --- larger odd shapes: exercises batch/feature padding + multi-tile grid ---
    B2, in2, outf2, T2 = 10, 24, 40, 20
    W2, U2 = init_rnn_params(jax.random.PRNGKey(1), in2, outf2)
    xs2 = jax.random.normal(k_seq2, (T2, B2, in2), jnp.float32)
    got2 = jax.block_until_ready(rnn_forward(xs2, W2, U2))
    refs2 = ref_seq(xs2, W2, U2, jnp.zeros((B2, outf2), jnp.float32))
    assert got2.shape == (T2, B2, outf2)
    assert jnp.allclose(got2, refs2, atol=1e-4, rtol=1e-4)

    # --- bf16 compute path (MXU-native rate); error compounds over T ---
    outs_bf16 = jax.block_until_ready(
        rnn_forward(xs, W, U, compute_dtype=jnp.bfloat16))
    assert outs_bf16.shape == (T, B, out_f)
    assert float(jnp.max(jnp.abs(outs_bf16 - refs))) < 0.1

    print("KERNEL_OK")
</pallas_src>

<mosaic_0001>
module attributes {stable_mosaic.version = 11 : i64} {
  func.func @_cell_kernel(%arg0: memref<8x128xf32, #tpu.memory_space<vmem>>, %arg1: memref<128x128xf32, #tpu.memory_space<vmem>>, %arg2: memref<8x128xf32, #tpu.memory_space<vmem>>, %arg3: memref<128x128xf32, #tpu.memory_space<vmem>>, %arg4: memref<8x128xf32, #tpu.memory_space<vmem>>) attributes {dimension_semantics = [], scalar_prefetch = 0 : i64, scratch_operands = 0 : i64, tpu.core_type = #tpu.core_type<tc>} {
    %c0 = arith.constant 0 : index
    %c0_0 = arith.constant 0 : index
    %0 = vector.load %arg0[%c0, %c0_0] : memref<8x128xf32, #tpu.memory_space<vmem>>, vector<8x128xf32>
    %c0_1 = arith.constant 0 : index
    %c0_2 = arith.constant 0 : index
    %1 = vector.load %arg1[%c0_1, %c0_2] : memref<128x128xf32, #tpu.memory_space<vmem>>, vector<128x128xf32>
    %cst = arith.constant dense<0.000000e+00> : vector<8x128xf32>
    %2 = tpu.matmul %0, %1, %cst {dimension_numbers = #tpu.dot_dimension_numbers<[1], [0], [0], [1], [0, 0, 1, 1], [], []>} : vector<8x128xf32>, vector<128x128xf32>, vector<8x128xf32> -> vector<8x128xf32>
    %c0_3 = arith.constant 0 : index
    %c0_4 = arith.constant 0 : index
    %3 = vector.load %arg2[%c0_3, %c0_4] : memref<8x128xf32, #tpu.memory_space<vmem>>, vector<8x128xf32>
    %c0_5 = arith.constant 0 : index
    %c0_6 = arith.constant 0 : index
    %4 = vector.load %arg3[%c0_5, %c0_6] : memref<128x128xf32, #tpu.memory_space<vmem>>, vector<128x128xf32>
    %cst_7 = arith.constant dense<0.000000e+00> : vector<8x128xf32>
    %5 = tpu.matmul %3, %4, %cst_7 {dimension_numbers = #tpu.dot_dimension_numbers<[1], [0], [0], [1], [0, 0, 1, 1], [], []>} : vector<8x128xf32>, vector<128x128xf32>, vector<8x128xf32> -> vector<8x128xf32>
    %6 = arith.addf %2, %5 : vector<8x128xf32>
    %7 = math.tanh %6 : vector<8x128xf32>
    %c0_8 = arith.constant 0 : index
    %c0_9 = arith.constant 0 : index
    %8 = vector.load %arg4[%c0_8, %c0_9] : memref<8x128xf32, #tpu.memory_space<vmem>>, vector<8x128xf32>
    tpu.vector_store %arg4[%c0_8, %c0_9], %7 {strides = array<i32>} : memref<8x128xf32, #tpu.memory_space<vmem>>, vector<8x128xf32>,
    return
  }
}

</mosaic_0001>

<bundles_post_ra>
// kernel: tpu_custom_call.1
= control target key start
LH: loop header
LB: loop body
LE: loop exit
PB: predicated region body
PF: predicated region fallthrough
CT: control target
= control target key end

     0   :  { %9 = vsyncpa [#allocation3], 0  ;;  %s662_s0 = inlined_call_operand.hbm [shape: f32[8,128], index: 0, kind: input, shape index: {}]   ;;  %s663_s1 = inlined_call_operand.hbm [shape: f32[128,128], index: 1, kind: input, shape index: {}]   ;;  %s664_s2 = inlined_call_operand.hbm [shape: f32[8,128], index: 2, kind: input, shape index: {}]   ;;  %s665_s3 = inlined_call_operand.hbm [shape: f32[128,128], index: 3, kind: input, shape index: {}]   ;;  %s666_s4 = inlined_call_operand.hbm [shape: f32[8,128], index: 4, kind: output, shape index: {}]  }
   0x1   :  { %10 = vsyncpa [#allocation6], 0 }
   0x2   :  { %11 = vsyncpa [#allocation9], 0 }
   0x3   :  { %12 = vsyncpa [#allocation4], 0  ;;  %s545_s15 = smov [#allocation5]   ;;  %s427_s19 = scalar_lea.hbm %s663_s1, 2048 }
   0x4   :  { %s28_s16 = sshll.u32 %s545_s15, 4  ;;  %p428_p0 = scmp.ne.s32.totalorder %s663_s1, %s427_s19  ;;  %s29_s16 = int_to_ptr.vmem [resolvable:$true] %s28_s16 }
   0x5   :  { %p431_p1 = scmp.lt.u32.totalorder %s427_s19, %s663_s1 }
   0x7   :  { %p433_p2 = pnand %p431_p1, %p428_p0 }
   0x9   :  { %436 = shalt.err (!%p433_p2)
}
   0xa   :  { %s437_s24 = scalar_lea.vmem %s29_s16, 2048  ;;  %p442_p4 = scmp.lt.s32.totalorder %s29_s16, %s29_s16 }
   0xb   :  { %p438_p3 = scmp.ne.s32.totalorder %s29_s16, %s437_s24  ;;  %p443_p5 = scmp.lt.s32.totalorder %s437_s24, %s437_s24 }
   0xd   :  { %p444_p6 = por %p443_p5, %p442_p4 }
   0xf   :  { %p445_p7 = pnand %p444_p6, %p438_p3 }
  0x11   :  { %448 = shalt.err (!%p445_p7)
}
  0x12   :  { %s546_s25 = smov 128   ;;  %s547_s26 = smov 8  }
  0x13   :  { %34 = dma.hbm_to_vmem [thread:$0]  %s663_s1, 2048, %s29_s16, [#allocation6], %s546_s25, %s546_s25, %s547_s26  }
  0x14   :  { %s548_s29 = smov [#allocation2]   ;;  %s549_s5 = smov [#allocation7]  }
  0x15   :  { %s19_s30 = sshll.u32 %s548_s29, 4  ;;  %s41_s6 = sshll.u32 %s549_s5, 4  ;;  %s20_s30 = int_to_ptr.vmem [resolvable:$true] %s19_s30  ;;  %s42_s6 = int_to_ptr.vmem [resolvable:$true] %s41_s6 }
  0x16   :  { %s449_s9 = scalar_lea.hbm %s662_s0, 128 }
  0x17   :  { %p450_p8 = scmp.ne.s32.totalorder %s662_s0, %s449_s9  ;;  %p453_p9 = scmp.lt.u32.totalorder %s449_s9, %s662_s0 }
  0x19   :  { %p455_p10 = pnand %p453_p9, %p450_p8 }
  0x1b   :  { %458 = shalt.err (!%p455_p10)
}
  0x1c   :  { %s459_s1 = scalar_lea.vmem %s20_s30, 128  ;;  %p464_p12 = scmp.lt.s32.totalorder %s20_s30, %s20_s30 }
  0x1d   :  { %p460_p11 = scmp.ne.s32.totalorder %s20_s30, %s459_s1  ;;  %p465_p13 = scmp.lt.s32.totalorder %s459_s1, %s459_s1 }
  0x1f   :  { %p466_p0 = por %p465_p13, %p464_p12 }
  0x21   :  { %p467_p1 = pnand %p466_p0, %p460_p11 }
  0x23   :  { %470 = shalt.err (!%p467_p1)
}
  0x24   :  { %22 = dma.hbm_to_vmem [thread:$0]  %s662_s0, 128, %s20_s30, [#allocation3]  }
  0x25   :  { %s471_s18 = scalar_lea.hbm %s664_s2, 128 }
  0x26   :  { %p472_p2 = scmp.ne.s32.totalorder %s664_s2, %s471_s18  ;;  %p475_p3 = scmp.lt.u32.totalorder %s471_s18, %s664_s2 }
  0x28   :  { %p477_p4 = pnand %p475_p3, %p472_p2 }
  0x2a   :  { %480 = shalt.err (!%p477_p4)
}
  0x2b   :  { %s481_s23 = scalar_lea.vmem %s42_s6, 128  ;;  %p486_p6 = scmp.lt.s32.totalorder %s42_s6, %s42_s6 }
  0x2c   :  { %p482_p5 = scmp.ne.s32.totalorder %s42_s6, %s481_s23  ;;  %p487_p7 = scmp.lt.s32.totalorder %s481_s23, %s481_s23 }
  0x2e   :  { %p488_p8 = por %p487_p7, %p486_p6 }
  0x30   :  { %p489_p9 = pnand %p488_p8, %p482_p5 }
  0x32   :  { %492 = shalt.err (!%p489_p9)
}
  0x33   :  { %44 = dma.hbm_to_vmem [thread:$0]  %s664_s2, 128, %s42_s6, [#allocation6]  }
  0x34   :  { %s550_s27 = smov [#allocation8]   ;;  %s493_s5 = scalar_lea.hbm %s665_s3, 2048 }
  0x35   :  { %s50_s28 = sshll.u32 %s550_s27, 4  ;;  %p494_p10 = scmp.ne.s32.totalorder %s665_s3, %s493_s5  ;;  %s51_s28 = int_to_ptr.vmem [resolvable:$true] %s50_s28 }
  0x36   :  { %p497_p11 = scmp.lt.u32.totalorder %s493_s5, %s665_s3 }
  0x38   :  { %p499_p12 = pnand %p497_p11, %p494_p10 }
  0x3a   :  { %502 = shalt.err (!%p499_p12)
}
  0x3b   :  { %s503_s11 = scalar_lea.vmem %s51_s28, 2048  ;;  %p508_p0 = scmp.lt.s32.totalorder %s51_s28, %s51_s28 }
  0x3c   :  { %p504_p13 = scmp.ne.s32.totalorder %s51_s28, %s503_s11  ;;  %p509_p1 = scmp.lt.s32.totalorder %s503_s11, %s503_s11 }
  0x3e   :  { %p510_p2 = por %p509_p1, %p508_p0 }
  0x40   :  { %p511_p3 = pnand %p510_p2, %p504_p13 }
  0x42   :  { %514 = shalt.err (!%p511_p3)
}
  0x43   :  { %56 = dma.hbm_to_vmem [thread:$0]  %s665_s3, 2048, %s51_s28, [#allocation9], %s546_s25, %s546_s25, %s547_s26  }
  0x44   :  { %537 = dma.done.wait [#allocation3], 128  }
  0x45   :  { %538 = vsyncadd [#allocation3], 4294967168 }
  0x46   :  { %539 = dma.done.wait [#allocation6], 2176  }
  0x47   :  { %540 = vsyncadd [#allocation6], 4294965120 }
  0x48   :  { %541 = dma.done.wait [#allocation9], 2048  }
  0x49   :  { %542 = vsyncadd [#allocation9], 4294965248  ;;  %v551_v0 = vmov 0.0|0.0   ;;  %vm552_vm0 = vmmov 0   ;;  %v553_v1 = vmov 0.0   ;;  %v87_v2 = vld [vmem:[#allocation8] sm:$0xff] }
  0x4a   :  { %366 = vmatprep.subr.bf16.mxu1 %v551_v0  ;;  %390 = vmatprep.subr.bf16.mxu0 %v551_v0  ;;  %v88_v3 = vld [vmem:[#allocation8 + $0x8] sm:$0xff]  ;;  %v70_v4 = vld [vmem:[#allocation5] sm:$0xff]  ;;  %v71_v6 = vld [vmem:[#allocation5 + $0x8] sm:$0xff]  ;;  %s554_s3 = smov [#allocation10]  }
  0x4b   :  { %328 = vmatprep.mubr.msk.f32.mxu1 %vm552_vm0, %v553_v1  ;;  %363 = vmatprep.mubr.msk.f32.mxu0 %vm552_vm0, %v553_v1  ;;  %v367_v5 = vpack.c.bf16 %v88_v3, %v87_v2  ;;  %v89_v7 = vld [vmem:[#allocation8 + $0x10] sm:$0xff]  ;;  %v90_v8 = vld [vmem:[#allocation8 + $0x18] sm:$0xff]  ;;  %v391_v9 = vpack.c.bf16 %v71_v6, %v70_v4  ;;  %v72_v10 = vld [vmem:[#allocation5 + $0x10] sm:$0xff]  ;;  %s251_s25 = sshll.u32 %s554_s3, 4  ;;  %s252_s25 = int_to_ptr.vmem [resolvable:$true] %s251_s25 }
  0x4c   :  { %v73_v11 = vld [vmem:[#allocation5 + $0x18] sm:$0xff]  ;;  %v370_v12 = vpack.c.bf16 %v90_v8, %v89_v7  ;;  %v91_v14 = vld [vmem:[#allocation8 + $0x20] sm:$0xff]  ;;  %v92_v15 = vld [vmem:[#allocation8 + $0x28] sm:$0xff]  ;;  %s515_s26 = scalar_lea.vmem %s252_s25, 128  ;;  %p520_p5 = scmp.lt.s32.totalorder %s252_s25, %s252_s25 }
  0x4d   :  { %368 = vmatpush3.bf16.msra.mxu1 %v367_v5  ;;  %392 = vmatpush3.bf16.msra.mxu0 %v391_v9  ;;  %v394_v13 = vpack.c.bf16 %v73_v11, %v72_v10  ;;  %v74_v16 = vld [vmem:[#allocation5 + $0x20] sm:$0xff]  ;;  %v75_v17 = vld [vmem:[#allocation5 + $0x28] sm:$0xff]  ;;  %v373_v18 = vpack.c.bf16 %v92_v15, %v91_v14  ;;  %v93_v20 = vld [vmem:[#allocation8 + $0x30] sm:$0xff]  ;;  %p516_p4 = scmp.ne.s32.totalorder %s252_s25, %s515_s26  ;;  %p521_p6 = scmp.lt.s32.totalorder %s515_s26, %s515_s26 }
  0x4e   :  { %369 = vmatprep.subr.bf16.mxu1 %v551_v0  ;;  %393 = vmatprep.subr.bf16.mxu0 %v551_v0  ;;  %v397_v19 = vpack.c.bf16 %v75_v17, %v74_v16  ;;  %v94_v21 = vld [vmem:[#allocation8 + $0x38] sm:$0xff]  ;;  %v76_v22 = vld [vmem:[#allocation5 + $0x30] sm:$0xff]  ;;  %v77_v23 = vld [vmem:[#allocation5 + $0x38] sm:$0xff] }
  0x4f   :  { %v376_v24 = vpack.c.bf16 %v94_v21, %v93_v20  ;;  %v400_v25 = vpack.c.bf16 %v77_v23, %v76_v22  ;;  %v95_v26 = vld [vmem:[#allocation8 + $0x40] sm:$0xff]  ;;  %v96_v27 = vld [vmem:[#allocation8 + $0x48] sm:$0xff]  ;;  %v78_v28 = vld [vmem:[#allocation5 + $0x40] sm:$0xff]  ;;  %p522_p7 = por %p521_p6, %p520_p5 }
  0x50   :  { %v79_v29 = vld [vmem:[#allocation5 + $0x48] sm:$0xff]  ;;  %v379_v30 = vpack.c.bf16 %v96_v27, %v95_v26  ;;  %v97_v32 = vld [vmem:[#allocation8 + $0x50] sm:$0xff]  ;;  %v98_v33 = vld [vmem:[#allocation8 + $0x58] sm:$0xff] }
  0x51   :  { %371 = vmatpush3.bf16.msra.mxu1 %v370_v12  ;;  %395 = vmatpush3.bf16.msra.mxu0 %v394_v13  ;;  %v403_v31 = vpack.c.bf16 %v79_v29, %v78_v28  ;;  %v80_v34 = vld [vmem:[#allocation5 + $0x50] sm:$0xff]  ;;  %v81_v35 = vld [vmem:[#allocation5 + $0x58] sm:$0xff]  ;;  %v382_v36 = vpack.c.bf16 %v98_v33, %v97_v32  ;;  %v99_v38 = vld [vmem:[#allocation8 + $0x60] sm:$0xff]  ;;  %p523_p8 = pnand %p522_p7, %p516_p4 }
  0x52   :  { %372 = vmatprep.subr.bf16.mxu1 %v551_v0  ;;  %396 = vmatprep.subr.bf16.mxu0 %v551_v0  ;;  %v406_v37 = vpack.c.bf16 %v81_v35, %v80_v34  ;;  %v100_v39 = vld [vmem:[#allocation8 + $0x68] sm:$0xff]  ;;  %v82_v40 = vld [vmem:[#allocation5 + $0x60] sm:$0xff]  ;;  %v83_v41 = vld [vmem:[#allocation5 + $0x68] sm:$0xff] }
  0x53   :  { %v385_v42 = vpack.c.bf16 %v100_v39, %v99_v38  ;;  %v409_v43 = vpack.c.bf16 %v83_v41, %v82_v40  ;;  %v101_v44 = vld [vmem:[#allocation8 + $0x70] sm:$0xff]  ;;  %v102_v45 = vld [vmem:[#allocation8 + $0x78] sm:$0xff]  ;;  %v84_v46 = vld [vmem:[#allocation5 + $0x70] sm:$0xff] }
  0x54   :  { %v85_v47 = vld [vmem:[#allocation5 + $0x78] sm:$0xff]  ;;  %v388_v48 = vpack.c.bf16 %v102_v45, %v101_v44  ;;  %v86_v50 = vld [vmem:[#allocation7] sm:$0xff] }
  0x55   :  { %374 = vmatpush3.bf16.msra.mxu1 %v373_v18  ;;  %398 = vmatpush3.bf16.msra.mxu0 %v397_v19  ;;  %v412_v49 = vpack.c.bf16 %v85_v47, %v84_v46  ;;  %v69_v51 = vld [vmem:[#allocation2] sm:$0xff] }
  0x56   :  { %375 = vmatprep.subr.bf16.mxu1 %v551_v0  ;;  %399 = vmatprep.subr.bf16.mxu0 %v551_v0 }
  0x59   :  { %377 = vmatpush3.bf16.msra.mxu1 %v376_v24  ;;  %401 = vmatpush3.bf16.msra.mxu0 %v400_v25 }
  0x5a   :  { %378 = vmatprep.subr.bf16.mxu1 %v551_v0  ;;  %402 = vmatprep.subr.bf16.mxu0 %v551_v0 }
  0x5d   :  { %380 = vmatpush3.bf16.msra.mxu1 %v379_v30  ;;  %404 = vmatpush3.bf16.msra.mxu0 %v403_v31 }
  0x5e   :  { %381 = vmatprep.subr.bf16.mxu1 %v551_v0  ;;  %405 = vmatprep.subr.bf16.mxu0 %v551_v0 }
  0x61   :  { %383 = vmatpush3.bf16.msra.mxu1 %v382_v36  ;;  %407 = vmatpush3.bf16.msra.mxu0 %v406_v37 }
  0x62   :  { %384 = vmatprep.subr.bf16.mxu1 %v551_v0  ;;  %408 = vmatprep.subr.bf16.mxu0 %v551_v0 }
  0x65   :  { %386 = vmatpush3.bf16.msra.mxu1 %v385_v42  ;;  %410 = vmatpush3.bf16.msra.mxu0 %v409_v43 }
  0x66   :  { %387 = vmatprep.subr.bf16.mxu1 %v551_v0  ;;  %411 = vmatprep.subr.bf16.mxu0 %v551_v0 }
  0x69   :  { %389 = vmatpush3.bf16.msra.mxu1 %v388_v48  ;;  %413 = vmatpush3.bf16.msra.mxu0 %v412_v49 }
  0x6c   :  { %329 = vmatmul.mubr.f32.vlgmr.msra.gmra.mrb[0].mxu1 %v86_v50  ;;  %364 = vmatmul.mubr.f32.vlgmr.msra.gmra.mrb[0].mxu0 %v69_v51 }
 0x13f   :  { %v169_v52 = vpop.f32.mrb[0].mxu1  ;;  %v239_v53 = vpop.f32.mrb[0].mxu0 }
 0x140   :  { %v330_v54 = vpop.f32.mrb[1].mxu1  ;;  %v240_v55 = vadd.f32 %v239_v53, %v169_v52  ;;  %v365_v56 = vpop.f32.mrb[1].mxu0 }
 0x142   :  { %425 = vtanh.f32 %v240_v55 }
 0x14c   :  { %v426_v57 = vpop.eup %425 }
 0x14d   :  { %244 = vst [vmem:[#allocation10] sm:$0xff] %v426_v57 }
 0x14e   :  { %526 = shalt.err (!%p523_p8)
}
 0x14f   :  { %s527_s1 = scalar_lea.hbm %s666_s4, 128 }
 0x150   :  { %p528_p9 = scmp.ne.s32.totalorder %s666_s4, %s527_s1  ;;  %p531_p10 = scmp.lt.u32.totalorder %s527_s1, %s666_s4 }
 0x152   :  { %p533_p11 = pnand %p531_p10, %p528_p9 }
 0x154   :  { %536 = shalt.err (!%p533_p11)
}
 0x155   :  { %254 = dma.vmem_to_hbm [thread:$0]  %s252_s25, 128, %s666_s4, [#allocation4]  }
 0x156   :  { %543 = dma.done.wait [#allocation4], 128  }
 0x157   :  { %544 = vsyncadd [#allocation4], 4294967168 }
 0x158   :  { %258 = vsyncpa [#allocation3], 1 }
 0x159   :  { %259 = vsyncpa [#allocation6], 1 }
 0x15a   :  { %260 = vsyncpa [#allocation9], 1 }
 0x15b   :  { %261 = vsyncpa [#allocation4], 1 }

</bundles_post_ra>
